<compile_context>
chip_gen: v5e
topology: v5e:2x2
jax: 0.10.0
libtpu: 0.0.40
codegen_flags: <defaults>
</compile_context>

<pallas_src>
import jax
import jax.numpy as jnp
from jax.experimental import pallas as pl
from jax.experimental.pallas import tpu as pltpu

LANE = 128  # lane-dense output width


def policy_net_kernel(x_ref, w1_ref, b1_ref, w2_ref, b2_ref, w3_ref, b3_ref,
                      out_ref):
    # Matmul compute dtype follows the weights (f32 by default, bf16 opt-in);
    # accumulation and all elementwise math stay in f32.
    cd = w1_ref.dtype
    x = x_ref[...].astype(cd)                                     # (TB, S)

    # fc1 + relu
    h1 = jnp.dot(x, w1_ref[...], preferred_element_type=jnp.float32)
    h1 = jnp.maximum(h1 + b1_ref[...], 0.0)                       # (TB, H) f32

    # fc2 + relu
    h2 = jnp.dot(h1.astype(cd), w2_ref[...],
                 preferred_element_type=jnp.float32)
    h2 = jnp.maximum(h2 + b2_ref[...], 0.0)                       # (TB, H) f32

    # fc3 (lane-dense: A padded to 128; padded cols have w=0, b=-1e30)
    logits = jnp.dot(h2.astype(cd), w3_ref[...],
                     preferred_element_type=jnp.float32)
    logits = logits + b3_ref[...]                                 # (TB, 128) f32

    # Numerically stable softmax over all 128 lanes.  Padded logits are
    # -1e30, so exp underflows to exactly 0 and normalization over the real
    # action columns is exact.  Exact division -> rows sum to 1 tightly.
    m = jnp.max(logits, axis=-1, keepdims=True)
    e = jnp.exp(logits - m)
    denom = jnp.sum(e, axis=-1, keepdims=True)
    out_ref[...] = e / denom


def _choose_batch_tile(batch, batch_tile):
    """Pick (tb, nb): full-extent single tile if it fits, else x16-aligned
    tiles with (heuristically) an even step count for v7x 2-TC balance."""
    if batch <= batch_tile:
        return batch, 1                       # full-extent block, no grid loop
    tb = max(16, (batch_tile // 16) * 16)     # x16 for bf16 sublane packing
    nb = pl.cdiv(batch, tb)
    if nb % 2 == 1:                           # prefer even nb (v7x 2 TCs)
        tb_alt = max(16, ((pl.cdiv(batch, nb + 1) + 15) // 16) * 16)
        nb_alt = pl.cdiv(batch, tb_alt)
        if nb_alt % 2 == 0:
            tb, nb = tb_alt, nb_alt
    return tb, nb


def policy_network_forward(x, params, *, batch_tile=1024, use_bf16=False):
    """x: (B, state_size) float32.  params: dict of w1,b1,w2,b2,w3,b3 (f32).

    One pallas_call evaluates the whole batch; weights stay VMEM-resident
    across all grid steps via constant-index BlockSpecs.
    """
    w1, b1 = params["w1"], params["b1"]
    w2, b2 = params["w2"], params["b2"]
    w3, b3 = params["w3"], params["b3"]

    B, S = x.shape
    H = w1.shape[1]
    A = w3.shape[1]
    A_pad = ((A + LANE - 1) // LANE) * LANE   # lane-dense output width

    # Pad fc3 once in the wrapper: zero weight columns + -1e30 bias entries
    # => padded logits exp() to exactly 0 inside the kernel.
    w3p = jnp.pad(w3, ((0, 0), (0, A_pad - A)))
    b3p = jnp.pad(b3, ((0, 0), (0, A_pad - A)), constant_values=-1e30)

    if use_bf16:
        # Cast ONCE outside the kernel so no per-grid-step convert is paid.
        w1, w2, w3p = (w.astype(jnp.bfloat16) for w in (w1, w2, w3p))

    tb, nb = _choose_batch_tile(B, batch_tile)

    # Weights/biases: full-extent blocks with constant index maps -> DMA'd
    # once, VMEM-resident across every grid step.
    resident = lambda arr: pl.BlockSpec(arr.shape, lambda i: (0,) * arr.ndim)

    weight_bytes = sum(int(a.size) * a.dtype.itemsize
                       for a in (w1, b1, w2, b2, w3p, b3p))
    cost = pl.CostEstimate(
        flops=2 * B * (S * H + H * H + H * A_pad),
        transcendentals=B * A_pad,
        bytes_accessed=B * S * x.dtype.itemsize + weight_bytes + B * A_pad * 4,
    )

    out = pl.pallas_call(
        policy_net_kernel,
        out_shape=jax.ShapeDtypeStruct((B, A_pad), jnp.float32),
        grid=(nb,),
        in_specs=[
            pl.BlockSpec((tb, S), lambda i: (i, 0)),   # x: tiled over batch
            resident(w1), resident(b1),
            resident(w2), resident(b2),
            resident(w3p), resident(b3p),
        ],
        out_specs=pl.BlockSpec((tb, A_pad), lambda i: (i, 0)),
        compiler_params=pltpu.CompilerParams(
            dimension_semantics=("parallel",)),        # 2x TC shard on v7x
        cost_estimate=cost,
    )(x, w1, b1, w2, b2, w3p, b3p)

    # Drop the padded action columns; valid rows are untouched by the
    # (masked) boundary-block writes.
    return out[:, :A]


def init_params(key, state_size, hidden_size, action_size):
    """Deterministic init mimicking PyTorch nn.Linear default:
    uniform(-1/sqrt(fan_in), 1/sqrt(fan_in)) for both weight and bias."""
    def linear_init(k, fan_in, fan_out):
        kw, kb = jax.random.split(k)
        bound = 1.0 / jnp.sqrt(jnp.float32(fan_in))
        w = jax.random.uniform(kw, (fan_in, fan_out), jnp.float32,
                               minval=-bound, maxval=bound)
        b = jax.random.uniform(kb, (1, fan_out), jnp.float32,
                               minval=-bound, maxval=bound)
        return w, b

    k1, k2, k3 = jax.random.split(key, 3)
    w1, b1 = linear_init(k1, state_size, hidden_size)
    w2, b2 = linear_init(k2, hidden_size, hidden_size)
    w3, b3 = linear_init(k3, hidden_size, action_size)
    return {"w1": w1, "b1": b1, "w2": w2, "b2": b2, "w3": w3, "b3": b3}


if __name__ == "__main__":
    key = jax.random.PRNGKey(0)
    kx, kp = jax.random.split(key)

    batch, state_size, hidden_size, action_size = 50, 16, 32, 8
    x = jax.random.normal(kx, (batch, state_size), jnp.float32)
    params = init_params(kp, state_size, hidden_size, action_size)

    # pure-JAX f32 reference
    def ref(xv, p):
        h1 = jax.nn.relu(xv @ p["w1"] + p["b1"])
        h2 = jax.nn.relu(h1 @ p["w2"] + p["b2"])
        return jax.nn.softmax(h2 @ p["w3"] + p["b3"], axis=-1)

    expected = ref(x, params)

    # 1) Default config: single full-extent batch tile, f32 compute.
    probs = jax.block_until_ready(policy_network_forward(x, params))
    assert probs.shape == (batch, action_size)
    assert jnp.allclose(jnp.sum(probs, axis=-1), 1.0, atol=1e-5)
    assert jnp.allclose(probs, expected, atol=1e-2)

    # 2) Small tile: exercises the multi-step grid, VMEM-resident weights and
    #    the masked boundary block (50 rows over 16-row tiles).
    probs_tiled = jax.block_until_ready(
        policy_network_forward(x, params, batch_tile=16))
    assert probs_tiled.shape == (batch, action_size)
    assert jnp.allclose(jnp.sum(probs_tiled, axis=-1), 1.0, atol=1e-5)
    assert jnp.allclose(probs_tiled, expected, atol=1e-2)

    print("KERNEL_OK")
</pallas_src>

<mosaic_0001>
module attributes {stable_mosaic.version = 11 : i64} {
  func.func @policy_net_kernel(%arg0: i32, %arg1: memref<50x16xf32, #tpu.memory_space<vmem>>, %arg2: memref<16x32xf32, #tpu.memory_space<vmem>>, %arg3: memref<1x32xf32, #tpu.memory_space<vmem>>, %arg4: memref<32x32xf32, #tpu.memory_space<vmem>>, %arg5: memref<1x32xf32, #tpu.memory_space<vmem>>, %arg6: memref<32x128xf32, #tpu.memory_space<vmem>>, %arg7: memref<1x128xf32, #tpu.memory_space<vmem>>, %arg8: memref<50x128xf32, #tpu.memory_space<vmem>>) attributes {dimension_semantics = [#tpu.dimension_semantics<parallel>], iteration_bounds = array<i64: 1>, scalar_prefetch = 0 : i64, scratch_operands = 0 : i64, tpu.core_type = #tpu.core_type<tc>, window_params = [{transform_indices = @transform_0, window_bounds = array<i64: 50, 16>}, {pipeline_mode = #tpu.pipeline_mode<synchronous>, transform_indices = @transform_1, window_bounds = array<i64: 16, 32>}, {pipeline_mode = #tpu.pipeline_mode<synchronous>, transform_indices = @transform_2, window_bounds = array<i64: 1, 32>}, {pipeline_mode = #tpu.pipeline_mode<synchronous>, transform_indices = @transform_3, window_bounds = array<i64: 32, 32>}, {pipeline_mode = #tpu.pipeline_mode<synchronous>, transform_indices = @transform_4, window_bounds = array<i64: 1, 32>}, {pipeline_mode = #tpu.pipeline_mode<synchronous>, transform_indices = @transform_5, window_bounds = array<i64: 32, 128>}, {pipeline_mode = #tpu.pipeline_mode<synchronous>, transform_indices = @transform_6, window_bounds = array<i64: 1, 128>}, {transform_indices = @transform_7, window_bounds = array<i64: 50, 128>}]} {
    %c0 = arith.constant 0 : index
    %c0_0 = arith.constant 0 : index
    %0 = vector.load %arg1[%c0, %c0_0] : memref<50x16xf32, #tpu.memory_space<vmem>>, vector<50x16xf32>
    %c0_1 = arith.constant 0 : index
    %c0_2 = arith.constant 0 : index
    %1 = vector.load %arg2[%c0_1, %c0_2] : memref<16x32xf32, #tpu.memory_space<vmem>>, vector<16x32xf32>
    %cst = arith.constant dense<0.000000e+00> : vector<50x32xf32>
    %2 = tpu.matmul %0, %1, %cst {dimension_numbers = #tpu.dot_dimension_numbers<[1], [0], [0], [1], [0, 0, 1, 1], [], []>} : vector<50x16xf32>, vector<16x32xf32>, vector<50x32xf32> -> vector<50x32xf32>
    %c0_3 = arith.constant 0 : index
    %c0_4 = arith.constant 0 : index
    %3 = vector.load %arg3[%c0_3, %c0_4] : memref<1x32xf32, #tpu.memory_space<vmem>>, vector<1x32xf32>
    %4 = vector.broadcast %3 : vector<1x32xf32> to vector<50x32xf32>
    %5 = arith.addf %2, %4 : vector<50x32xf32>
    %cst_5 = arith.constant 0.000000e+00 : f32
    %6 = vector.broadcast %cst_5 : f32 to vector<50x32xf32>
    %7 = arith.maximumf %5, %6 : vector<50x32xf32>
    %c0_6 = arith.constant 0 : index
    %c0_7 = arith.constant 0 : index
    %8 = vector.load %arg4[%c0_6, %c0_7] : memref<32x32xf32, #tpu.memory_space<vmem>>, vector<32x32xf32>
    %cst_8 = arith.constant dense<0.000000e+00> : vector<50x32xf32>
    %9 = tpu.matmul %7, %8, %cst_8 {dimension_numbers = #tpu.dot_dimension_numbers<[1], [0], [0], [1], [0, 0, 1, 1], [], []>} : vector<50x32xf32>, vector<32x32xf32>, vector<50x32xf32> -> vector<50x32xf32>
    %c0_9 = arith.constant 0 : index
    %c0_10 = arith.constant 0 : index
    %10 = vector.load %arg5[%c0_9, %c0_10] : memref<1x32xf32, #tpu.memory_space<vmem>>, vector<1x32xf32>
    %11 = vector.broadcast %10 : vector<1x32xf32> to vector<50x32xf32>
    %12 = arith.addf %9, %11 : vector<50x32xf32>
    %cst_11 = arith.constant 0.000000e+00 : f32
    %13 = vector.broadcast %cst_11 : f32 to vector<50x32xf32>
    %14 = arith.maximumf %12, %13 : vector<50x32xf32>
    %c0_12 = arith.constant 0 : index
    %c0_13 = arith.constant 0 : index
    %15 = vector.load %arg6[%c0_12, %c0_13] : memref<32x128xf32, #tpu.memory_space<vmem>>, vector<32x128xf32>
    %cst_14 = arith.constant dense<0.000000e+00> : vector<50x128xf32>
    %16 = tpu.matmul %14, %15, %cst_14 {dimension_numbers = #tpu.dot_dimension_numbers<[1], [0], [0], [1], [0, 0, 1, 1], [], []>} : vector<50x32xf32>, vector<32x128xf32>, vector<50x128xf32> -> vector<50x128xf32>
    %c0_15 = arith.constant 0 : index
    %c0_16 = arith.constant 0 : index
    %17 = vector.load %arg7[%c0_15, %c0_16] : memref<1x128xf32, #tpu.memory_space<vmem>>, vector<1x128xf32>
    %18 = vector.broadcast %17 : vector<1x128xf32> to vector<50x128xf32>
    %19 = arith.addf %16, %18 : vector<50x128xf32>
    %cst_17 = arith.constant dense<0xFF800000> : vector<50xf32>
    %20 = vector.multi_reduction <maximumf>, %19, %cst_17 [1] : vector<50x128xf32> to vector<50xf32>
    %21 = vector.shape_cast %20 : vector<50xf32> to vector<50x1xf32>
    %22 = vector.broadcast %21 : vector<50x1xf32> to vector<50x128xf32>
    %23 = arith.subf %19, %22 : vector<50x128xf32>
    %24 = math.exp %23 : vector<50x128xf32>
    %cst_18 = arith.constant dense<0.000000e+00> : vector<50xf32>
    %25 = vector.multi_reduction <add>, %24, %cst_18 [1] : vector<50x128xf32> to vector<50xf32>
    %26 = vector.shape_cast %25 : vector<50xf32> to vector<50x1xf32>
    %27 = vector.broadcast %26 : vector<50x1xf32> to vector<50x128xf32>
    %28 = arith.divf %24, %27 : vector<50x128xf32>
    %c0_19 = arith.constant 0 : index
    %c0_20 = arith.constant 0 : index
    %29 = vector.load %arg8[%c0_19, %c0_20] : memref<50x128xf32, #tpu.memory_space<vmem>>, vector<50x128xf32>
    tpu.vector_store %arg8[%c0_19, %c0_20], %28 {strides = array<i32>} : memref<50x128xf32, #tpu.memory_space<vmem>>, vector<50x128xf32>,
    return
  }
  func.func @transform_0(%arg0: i32) -> (i32, i32) {
    %c0_i32 = arith.constant 0 : i32
    %c0_i32_0 = arith.constant 0 : i32
    return %arg0, %c0_i32 : i32, i32
  }
  func.func @transform_1(%arg0: i32) -> (i32, i32) {
    %c0_i32 = arith.constant 0 : i32
    %c0_i32_0 = arith.constant 0 : i32
    %c0_i32_1 = arith.constant 0 : i32
    return %c0_i32, %c0_i32_0 : i32, i32
  }
  func.func @transform_2(%arg0: i32) -> (i32, i32) {
    %c0_i32 = arith.constant 0 : i32
    %c0_i32_0 = arith.constant 0 : i32
    %c0_i32_1 = arith.constant 0 : i32
    return %c0_i32, %c0_i32_0 : i32, i32
  }
  func.func @transform_3(%arg0: i32) -> (i32, i32) {
    %c0_i32 = arith.constant 0 : i32
    %c0_i32_0 = arith.constant 0 : i32
    %c0_i32_1 = arith.constant 0 : i32
    return %c0_i32, %c0_i32_0 : i32, i32
  }
  func.func @transform_4(%arg0: i32) -> (i32, i32) {
    %c0_i32 = arith.constant 0 : i32
    %c0_i32_0 = arith.constant 0 : i32
    %c0_i32_1 = arith.constant 0 : i32
    return %c0_i32, %c0_i32_0 : i32, i32
  }
  func.func @transform_5(%arg0: i32) -> (i32, i32) {
    %c0_i32 = arith.constant 0 : i32
    %c0_i32_0 = arith.constant 0 : i32
    %c0_i32_1 = arith.constant 0 : i32
    return %c0_i32, %c0_i32_0 : i32, i32
  }
  func.func @transform_6(%arg0: i32) -> (i32, i32) {
    %c0_i32 = arith.constant 0 : i32
    %c0_i32_0 = arith.constant 0 : i32
    %c0_i32_1 = arith.constant 0 : i32
    return %c0_i32, %c0_i32_0 : i32, i32
  }
  func.func @transform_7(%arg0: i32) -> (i32, i32) {
    %c0_i32 = arith.constant 0 : i32
    %c0_i32_0 = arith.constant 0 : i32
    return %arg0, %c0_i32 : i32, i32
  }
}

</mosaic_0001>

<bundles_post_ra>
// kernel: tpu_custom_call.1
= control target key start
LH: loop header
LB: loop body
LE: loop exit
PB: predicated region body
PF: predicated region fallthrough
CT: control target
= control target key end

     0   :  { %12 = vsyncpa [#allocation3], 0  ;;  %s723_s0 = inlined_call_operand.vmem [shape: f32[50,16], index: 0, kind: input, shape index: {}]   ;;  %s724_s1 = inlined_call_operand.hbm [shape: f32[16,32], index: 1, kind: input, shape index: {}]   ;;  %s725_s2 = inlined_call_operand.vmem [shape: f32[1,32], index: 2, kind: input, shape index: {}]   ;;  %s726_s3 = inlined_call_operand.vmem [shape: f32[32,32], index: 3, kind: input, shape index: {}]   ;;  %s727_s4 = inlined_call_operand.vmem [shape: f32[1,32], index: 4, kind: input, shape index: {}]   ;;  %s728_s5 = inlined_call_operand.vmem [shape: f32[32,128], index: 5, kind: input, shape index: {}]   ;;  %s729_s6 = inlined_call_operand.vmem [shape: f32[1,128], index: 6, kind: input, shape index: {}]   ;;  %s730_s7 = inlined_call_operand.hbm [shape: f32[50,128], index: 7, kind: output, shape index: {}]  }
   0x1   :  { %13 = vsyncpa [#allocation4], 0  ;;  %s20_s26 = sshll.u32 %s724_s1, 4  ;;  %s566_s27 = smov [#allocation2]   ;;  %s21_s26 = int_to_ptr.hbm [resolvable:$true] %s20_s26 }
   0x2   :  { %s22_s28 = sshll.u32 %s566_s27, 4  ;;  %s567_s29 = smov 128   ;;  %s23_s28 = int_to_ptr.vmem [resolvable:$true] %s22_s28 }
   0x3   :  { %s568_s30 = smov 8  }
   0x4   :  { %28 = dma.hbm_to_vmem [thread:$0]  %s21_s26, 256, %s23_s28, [#allocation3], %s567_s29, %s567_s29, %s568_s30  }
   0x5   :  { %562 = dma.done.wait [#allocation3], 256  }
   0x6   :  { %563 = vsyncadd [#allocation3], 4294967040  ;;  %v51_v0 = vld [vmem:[#allocation2 + $0x8] sm:$0xff]  ;;  %v50_v1 = vld [vmem:[#allocation2] sm:$0xff]  ;;  %vm56_vm0 = vcmask 130048   ;;  %vm131_vm1 = vcmask 261120  }
   0x7   :  { %92 = vmatpush.msra.mxu0 %v51_v0  ;;  %v43_v2 = vld [vmem:[%s723_s0] sm:$0xff]  ;;  %469 = vmatpush.msra.mxu1 %v51_v0  ;;  %v44_v3 = vld [vmem:[%s723_s0 + $0x8] sm:$0xff]  ;;  %v49_v4 = vld [vmem:[%s723_s0 + $0x30] sm:$0x3]  ;;  %vm277_vm2 = vcmask 1041408   ;;  %s435_s19 = sshll.u32 %s730_s7, 4  ;;  %s436_s19 = int_to_ptr.hbm [resolvable:$true] %s435_s19 }
   0x8   :  { %v126_v5 = vld [vmem:[%s726_s3 + $0x18] sm:$0xff]  ;;  %v45_v6 = vld [vmem:[%s723_s0 + $0x10] sm:$0xff]  ;;  %v47_v8 = vld [vmem:[%s723_s0 + $0x20] sm:$0xff] }
   0x9   :  { %93 = vmatpush.msra.mxu0 %v50_v1  ;;  %470 = vmatpush.msra.mxu1 %v50_v1  ;;  %v46_v7 = vld [vmem:[%s723_s0 + $0x18] sm:$0xff]  ;;  %v48_v9 = vld [vmem:[%s723_s0 + $0x28] sm:$0xff]  ;;  %v125_v10 = vld [vmem:[%s726_s3 + $0x10] sm:$0xff] }
   0xa   :  { %448 = vmatmul.msk.f32.vlgmr.msra.gmra.mxu0 %vm56_vm0, %v43_v2  ;;  %454 = vmatmul.msk.f32.vlgmr.msra.gmra.mxu1 %vm56_vm0, %v49_v4  ;;  %v124_v11 = vld [vmem:[%s726_s3 + $0x8] sm:$0xff]  ;;  %v123_v12 = vld [vmem:[%s726_s3] sm:$0xff]  ;;  %v201_v23 = vld [vmem:[%s728_s5 + $0x18] sm:$0xff] }
   0xb   :  { %471 = vmatpush.msra.mxu3 %v126_v5  ;;  %165 = vmatpush.msrb.mxu1 %v126_v5  ;;  %v483_v13 = vld [vmem:[%s725_s2] ss:$0 sm:$0xff]  ;;  %v200_v36 = vld [vmem:[%s728_s5 + $0x10] sm:$0xff]  ;;  %v199_v37 = vld [vmem:[%s728_s5 + $0x8] sm:$0xff] }
   0xc   :  { %475 = vmatpush.msra.mxu2 %v201_v23  ;;  %v198_v38 = vld [vmem:[%s728_s5] sm:$0xff] }
   0xd   :  { %166 = vmatpush.msrb.mxu1 %v125_v10  ;;  %472 = vmatpush.msra.mxu3 %v125_v10  ;;  %v484_v39 = vld [vmem:[%s727_s4] ss:$0 sm:$0xff] }
   0xe   :  { %476 = vmatpush.msra.mxu2 %v200_v36  ;;  %v485_v61 = vld [vmem:[%s729_s6] ss:$0 sm:$0xff]  ;;  %s569_s6 = smov [#allocation5]  }
   0xf   :  { %167 = vmatpush.msrb.mxu1 %v124_v11  ;;  %473 = vmatpush.msra.mxu3 %v124_v11  ;;  %s433_s16 = sshll.u32 %s569_s6, 4  ;;  %s434_s16 = int_to_ptr.vmem [resolvable:$true] %s433_s16 }
  0x10   :  { %477 = vmatpush.msra.mxu2 %v199_v37 }
  0x11   :  { %168 = vmatpush.msrb.mxu1 %v123_v12  ;;  %474 = vmatpush.msra.mxu3 %v123_v12 }
  0x12   :  { %449 = vmatmul.msk.f32.gmra.mxu0 %vm56_vm0, %v44_v3  ;;  %478 = vmatpush.msra.mxu2 %v198_v38 }
  0x13   :  { %239 = vmatpush.msra.mxu1 %v201_v23 }
  0x15   :  { %240 = vmatpush.msra.mxu1 %v200_v36 }
  0x17   :  { %241 = vmatpush.msra.mxu1 %v199_v37 }
  0x19   :  { %242 = vmatpush.msra.mxu1 %v198_v38 }
  0x1a   :  { %450 = vmatmul.msk.f32.gmra.mxu0 %vm56_vm0, %v45_v6 }
  0x22   :  { %451 = vmatmul.msk.f32.gmra.mxu0 %vm56_vm0, %v46_v7 }
  0x2a   :  { %452 = vmatmul.msk.f32.gmra.mxu0 %vm56_vm0, %v47_v8 }
  0x32   :  { %453 = vmatmul.msk.f32.gmra.mxu0 %vm56_vm0, %v48_v9 }
  0x87   :  { %v95_v14 = vpop.f32.mrf.mxu0  ;;  %v113_v32 = vpop.f32.mrf.mxu1 }
  0x88   :  { %v96_v15 = vadd.f32 %v483_v13, %v95_v14  ;;  %v114_v34 = vadd.f32 %v483_v13, %v113_v32 }
  0x8a   :  { %v116_v16 = vmax.f32 %v96_v15, 0.0  ;;  %v122_v35 = vmax.f32 %v114_v34, 0.0 }
  0x8c   :  { %455 = vmatmul.msk.f32.vlgmr.msrb.gmra.mxu1 %vm131_vm1, %v116_v16 }
  0x8f   :  { %v98_v17 = vpop.f32.mrf.mxu0 }
  0x90   :  { %v99_v18 = vadd.f32 %v483_v13, %v98_v17 }
  0x92   :  { %v117_v19 = vmax.f32 %v99_v18, 0.0 }
  0x94   :  { %456 = vmatmul.msk.f32.gmra.mxu1 %vm131_vm1, %v117_v19 }
  0x97   :  { %v101_v20 = vpop.f32.mrf.mxu0 }
  0x98   :  { %v102_v21 = vadd.f32 %v483_v13, %v101_v20 }
  0x9a   :  { %v118_v22 = vmax.f32 %v102_v21, 0.0 }
  0x9c   :  { %457 = vmatmul.msk.f32.vlgmr.msra.gmra.mxu3 %vm131_vm1, %v118_v22 }
  0x9f   :  { %v104_v24 = vpop.f32.mrf.mxu0 }
  0xa0   :  { %v105_v25 = vadd.f32 %v483_v13, %v104_v24 }
  0xa2   :  { %v119_v26 = vmax.f32 %v105_v25, 0.0 }
  0xa4   :  { %458 = vmatmul.msk.f32.gmra.mxu3 %vm131_vm1, %v119_v26 }
  0xa7   :  { %v107_v27 = vpop.f32.mrf.mxu0 }
  0xa8   :  { %v108_v28 = vadd.f32 %v483_v13, %v107_v27 }
  0xaa   :  { %v120_v29 = vmax.f32 %v108_v28, 0.0 }
  0xac   :  { %459 = vmatmul.msk.f32.gmra.mxu3 %vm131_vm1, %v120_v29 }
  0xaf   :  { %v110_v30 = vpop.f32.mrf.mxu0 }
  0xb0   :  { %v111_v31 = vadd.f32 %v483_v13, %v110_v30 }
  0xb2   :  { %v121_v33 = vmax.f32 %v111_v31, 0.0 }
  0xb4   :  { %460 = vmatmul.msk.f32.gmra.mxu3 %vm131_vm1, %v121_v33 }
  0xbc   :  { %461 = vmatmul.msk.f32.gmra.mxu3 %vm131_vm1, %v122_v35 }
 0x109   :  { %v170_v40 = vpop.f32.mrf.mxu1 }
 0x10a   :  { %v171_v41 = vadd.f32 %v484_v39, %v170_v40 }
 0x10c   :  { %v191_v42 = vmax.f32 %v171_v41, 0.0 }
 0x10e   :  { %462 = vmatmul.msk.f32.vlgmr.msra.gmra.mxu1 %vm131_vm1, %v191_v42 }
 0x111   :  { %v173_v43 = vpop.f32.mrf.mxu1 }
 0x112   :  { %v174_v44 = vadd.f32 %v484_v39, %v173_v43 }
 0x114   :  { %v192_v45 = vmax.f32 %v174_v44, 0.0 }
 0x116   :  { %463 = vmatmul.msk.f32.gmra.mxu1 %vm131_vm1, %v192_v45 }
 0x11f   :  { %v176_v46 = vpop.f32.mrf.mxu3 }
 0x120   :  { %v177_v47 = vadd.f32 %v484_v39, %v176_v46 }
 0x122   :  { %v193_v48 = vmax.f32 %v177_v47, 0.0 }
 0x124   :  { %464 = vmatmul.msk.f32.vlgmr.msra.gmra.mxu2 %vm131_vm1, %v193_v48 }
 0x127   :  { %v179_v49 = vpop.f32.mrf.mxu3 }
 0x128   :  { %v180_v50 = vadd.f32 %v484_v39, %v179_v49 }
 0x12a   :  { %v194_v51 = vmax.f32 %v180_v50, 0.0 }
 0x12c   :  { %465 = vmatmul.msk.f32.gmra.mxu2 %vm131_vm1, %v194_v51 }
 0x12f   :  { %v182_v52 = vpop.f32.mrf.mxu3 }
 0x130   :  { %v183_v53 = vadd.f32 %v484_v39, %v182_v52 }
 0x132   :  { %v195_v54 = vmax.f32 %v183_v53, 0.0 }
 0x134   :  { %466 = vmatmul.msk.f32.gmra.mxu2 %vm131_vm1, %v195_v54 }
 0x137   :  { %v185_v55 = vpop.f32.mrf.mxu3 }
 0x138   :  { %v186_v56 = vadd.f32 %v484_v39, %v185_v55 }
 0x13a   :  { %v196_v57 = vmax.f32 %v186_v56, 0.0 }
 0x13c   :  { %467 = vmatmul.msk.f32.gmra.mxu2 %vm131_vm1, %v196_v57 }
 0x13f   :  { %v188_v58 = vpop.f32.mrf.mxu3 }
 0x140   :  { %v189_v59 = vadd.f32 %v484_v39, %v188_v58 }
 0x142   :  { %v197_v60 = vmax.f32 %v189_v59, 0.0 }
 0x144   :  { %468 = vmatmul.msk.f32.gmra.mxu2 %vm131_vm1, %v197_v60 }
 0x18b   :  { %v244_v62 = vpop.f32.mrf.mxu1 }
 0x18c   :  { %v245_v63 = vadd.f32 %v485_v61, %v244_v62 }
 0x18e   :  { %265 = vmax.xlane.f32.xlu0 %v245_v63 }
 0x193   :  { %v247_v0 = vpop.f32.mrf.mxu1 }
 0x194   :  { %v248_v1 = vadd.f32 %v485_v61, %v247_v0 }
 0x196   :  { %267 = vmax.xlane.f32.xlu1 %v248_v1 }
 0x1a7   :  { %v250_v2 = vpop.f32.mrf.mxu2 }
 0x1a8   :  { %v251_v3 = vadd.f32 %v485_v61, %v250_v2 }
 0x1aa   :  { %269 = vmax.xlane.f32.xlu1 %v251_v3 }
 0x1af   :  { %v253_v4 = vpop.f32.mrf.mxu2 }
 0x1b0   :  { %v254_v5 = vadd.f32 %v485_v61, %v253_v4 }
 0x1b2   :  { %271 = vmax.xlane.f32.xlu2 %v254_v5 }
 0x1b7   :  { %v256_v6 = vpop.f32.mrf.mxu2 }
 0x1b8   :  { %v257_v7 = vadd.f32 %v485_v61, %v256_v6 }
 0x1ba   :  { %273 = vmax.xlane.f32.xlu2 %v257_v7 }
 0x1bf   :  { %v259_v8 = vpop.f32.mrf.mxu2 }
 0x1c0   :  { %v260_v12 = vadd.f32 %v485_v61, %v259_v8 }
 0x1c7   :  { %v262_v9 = vpop.f32.mrf.mxu2 }
 0x1c8   :  { %v263_v10 = vadd.f32 %v485_v61, %v262_v9 }
 0x1ca   :  { %v278_v11 = vsel %vm277_vm2, %v263_v10, -inf }
 0x1cb   :  { %279 = vmax.xlane.f32.xlu0 %v278_v11 }
 0x1d3   :  { %275 = vmax.xlane.f32.xlu0 %v260_v12 }
 0x201   :  { %v266_v13 = vpop.xlane.xlu0 %265 }
 0x202   :  { %v281_v14 = vsub.f32 %v245_v63, %v266_v13 }
 0x204   :  { %v288_v15 = vmul.f32 1.442695, %v281_v14 }
 0x206   :  { %486 = vpow2.f32 %v288_v15 }
 0x209   :  { %v268_v16 = vpop.xlane.xlu1 %267 }
 0x20a   :  { %v282_v17 = vsub.f32 %v248_v1, %v268_v16 }
 0x20c   :  { %v487_v18 = vpop.eup %486  ;;  %v290_v19 = vmul.f32 1.442695, %v282_v17 }
 0x20d   :  { %302 = vadd.xlane.f32.xlu1 %v487_v18 }
 0x20e   :  { %488 = vpow2.f32 %v290_v19 }
 0x214   :  { %v692_v20 = vpop.eup %488 }
 0x215   :  { %304 = vadd.xlane.f32.xlu2 %v692_v20 }
 0x21d   :  { %v270_v21 = vpop.xlane.xlu1 %269 }
 0x21e   :  { %v283_v22 = vsub.f32 %v251_v3, %v270_v21 }
 0x220   :  { %v292_v23 = vmul.f32 1.442695, %v283_v22 }
 0x222   :  { %490 = vpow2.f32 %v292_v23 }
 0x225   :  { %v272_v24 = vpop.xlane.xlu2 %271 }
 0x226   :  { %v284_v25 = vsub.f32 %v254_v5, %v272_v24 }
 0x228   :  { %v695_v26 = vpop.eup %490  ;;  %v294_v27 = vmul.f32 1.442695, %v284_v25 }
 0x229   :  { %306 = vadd.xlane.f32.xlu0 %v695_v26 }
 0x22a   :  { %492 = vpow2.f32 %v294_v27 }
 0x22d   :  { %v274_v28 = vpop.xlane.xlu2 %273 }
 0x22e   :  { %v285_v29 = vsub.f32 %v257_v7, %v274_v28 }
 0x230   :  { %v698_v30 = vpop.eup %492  ;;  %v296_v31 = vmul.f32 1.442695, %v285_v29 }
 0x231   :  { %308 = vadd.xlane.f32.xlu1 %v698_v30 }
 0x232   :  { %494 = vpow2.f32 %v296_v31 }
 0x238   :  { %v701_v32 = vpop.eup %494 }
 0x239   :  { %310 = vadd.xlane.f32.xlu2 %v701_v32 }
 0x23e   :  { %v280_v33 = vpop.xlane.xlu0 %279 }
 0x23f   :  { %v287_v34 = vsub.f32 %v263_v10, %v280_v33 }
 0x241   :  { %v300_v35 = vmul.f32 1.442695, %v287_v34 }
 0x243   :  { %496 = vpow2.f32 %v300_v35 }
 0x246   :  { %v276_v36 = vpop.xlane.xlu0 %275 }
 0x247   :  { %v286_v37 = vsub.f32 %v260_v12, %v276_v36 }
 0x249   :  { %v704_v38 = vpop.eup %496  ;;  %v298_v39 = vmul.f32 1.442695, %v286_v37 }
 0x24a   :  { %v314_v40 = vsel %vm277_vm2, %v704_v38, 0.0 }
 0x24b   :  { %498 = vpow2.f32 %v298_v39  ;;  %315 = vadd.xlane.f32.xlu1 %v314_v40 }
 0x251   :  { %v708_v41 = vpop.eup %498 }
 0x252   :  { %312 = vadd.xlane.f32.xlu0 %v708_v41 }
 0x280   :  { %v303_v42 = vpop.xlane.xlu1 %302 }
 0x281   :  { %500 = vrcp.f32 %v303_v42  ;;  %v328_v47 = vand.u32 2147483648, %v303_v42  ;;  %v326_v49 = vand.u32 2147483647, %v303_v42  ;;  %vm322_vm4 = vweird.f32 %v303_v42 }
 0x283   :  { %v329_v52 = vor.u32 1.1754944e-38, %v328_v47  ;;  %vm327_vm6 = vcmp.eq.f32.partialorder %v326_v49, 8.507059e+37 }
 0x287   :  { %v501_v43 = vpop.eup %500 }
 0x288   :  { %v318_v44 = vmul.f32 %v501_v43, %v303_v42  ;;  %v305_v45 = vpop.xlane.xlu2 %304  ;;  %vm323_vm3 = vweird.f32 %v501_v43 }
 0x289   :  { %502 = vrcp.f32 %v305_v45  ;;  %vm324_vm5 = vmor %vm322_vm4, %vm323_vm3  ;;  %v343_v58 = vand.u32 2147483648, %v305_v45  ;;  %v341_v60 = vand.u32 2147483647, %v305_v45  ;;  %vm337_vm8 = vweird.f32 %v305_v45 }
 0x28a   :  { %v319_v46 = vsub.f32 1.0, %v318_v44 }
 0x28b   :  { %v344_v62 = vor.u32 1.1754944e-38, %v343_v58  ;;  %vm342_vm10 = vcmp.eq.f32.partialorder %v341_v60, 8.507059e+37 }
 0x28c   :  { %v320_v48 = vmul.f32 %v501_v43, %v319_v46 }
 0x28e   :  { %v321_v50 = vadd.f32 %v501_v43, %v320_v48 }
 0x28f   :  { %v503_v51 = vpop.eup %502 }
 0x290   :  { %v325_v53 = vsel %vm324_vm5, %v501_v43, %v321_v50  ;;  %v333_v54 = vmul.f32 %v503_v51, %v305_v45  ;;  %vm338_vm7 = vweird.f32 %v503_v51 }
 0x291   :  { %v330_v55 = vsel %vm327_vm6, %v329_v52, %v325_v53  ;;  %vm339_vm9 = vmor %vm337_vm8, %vm338_vm7 }
 0x292   :  { %v331_v56 = vmul.f32 %v487_v18, %v330_v55  ;;  %v334_v57 = vsub.f32 1.0, %v333_v54 }
 0x294   :  { %422 = vst [vmem:[#allocation5] sm:$0xff] %v331_v56  ;;  %v335_v59 = vmul.f32 %v503_v51, %v334_v57 }
 0x296   :  { %v336_v61 = vadd.f32 %v503_v51, %v335_v59 }
 0x298   :  { %v340_v63 = vsel %vm339_vm9, %v503_v51, %v336_v61 }
 0x299   :  { %v345_v0 = vsel %vm342_vm10, %v344_v62, %v340_v63 }
 0x29a   :  { %v346_v1 = vmul.f32 %v692_v20, %v345_v0 }
 0x29c   :  { %423 = vst [vmem:[#allocation5 + $0x8] sm:$0xff] %v346_v1  ;;  %v307_v2 = vpop.xlane.xlu0 %306 }
 0x29d   :  { %504 = vrcp.f32 %v307_v2  ;;  %v358_v7 = vand.u32 2147483648, %v307_v2  ;;  %v356_v9 = vand.u32 2147483647, %v307_v2  ;;  %vm352_vm12 = vweird.f32 %v307_v2 }
 0x29f   :  { %v359_v12 = vor.u32 1.1754944e-38, %v358_v7  ;;  %vm357_vm14 = vcmp.eq.f32.partialorder %v356_v9, 8.507059e+37 }
 0x2a3   :  { %v505_v3 = vpop.eup %504 }
 0x2a4   :  { %v348_v4 = vmul.f32 %v505_v3, %v307_v2  ;;  %v309_v5 = vpop.xlane.xlu1 %308  ;;  %vm353_vm11 = vweird.f32 %v505_v3 }
 0x2a5   :  { %506 = vrcp.f32 %v309_v5  ;;  %vm354_vm13 = vmor %vm352_vm12, %vm353_vm11  ;;  %v373_v19 = vand.u32 2147483648, %v309_v5  ;;  %v371_v21 = vand.u32 2147483647, %v309_v5  ;;  %vm367_vm0 = vweird.f32 %v309_v5 }
 0x2a6   :  { %v349_v6 = vsub.f32 1.0, %v348_v4 }
 0x2a7   :  { %v374_v24 = vor.u32 1.1754944e-38, %v373_v19  ;;  %vm372_vm2 = vcmp.eq.f32.partialorder %v371_v21, 8.507059e+37 }
 0x2a8   :  { %v350_v8 = vmul.f32 %v505_v3, %v349_v6 }
 0x2aa   :  { %v351_v10 = vadd.f32 %v505_v3, %v350_v8 }
 0x2ab   :  { %v507_v11 = vpop.eup %506 }
 0x2ac   :  { %v355_v13 = vsel %vm354_vm13, %v505_v3, %v351_v10  ;;  %v363_v14 = vmul.f32 %v507_v11, %v309_v5  ;;  %v311_v15 = vpop.xlane.xlu2 %310  ;;  %vm368_vm15 = vweird.f32 %v507_v11 }
 0x2ad   :  { %v360_v16 = vsel %vm357_vm14, %v359_v12, %v355_v13  ;;  %508 = vrcp.f32 %v311_v15  ;;  %vm369_vm1 = vmor %vm367_vm0, %vm368_vm15  ;;  %v388_v33 = vand.u32 2147483648, %v311_v15  ;;  %v386_v34 = vand.u32 2147483647, %v311_v15 }
 0x2ae   :  { %v361_v17 = vmul.f32 %v695_v26, %v360_v16  ;;  %v364_v18 = vsub.f32 1.0, %v363_v14  ;;  %vm382_vm4 = vweird.f32 %v311_v15 }
 0x2af   :  { %v389_v36 = vor.u32 1.1754944e-38, %v388_v33  ;;  %vm387_vm6 = vcmp.eq.f32.partialorder %v386_v34, 8.507059e+37 }
 0x2b0   :  { %424 = vst [vmem:[#allocation5 + $0x10] sm:$0xff] %v361_v17  ;;  %v365_v20 = vmul.f32 %v507_v11, %v364_v18 }
 0x2b2   :  { %v366_v22 = vadd.f32 %v507_v11, %v365_v20 }
 0x2b3   :  { %v509_v23 = vpop.eup %508 }
 0x2b4   :  { %v370_v25 = vsel %vm369_vm1, %v507_v11, %v366_v22  ;;  %v378_v27 = vmul.f32 %v509_v23, %v311_v15  ;;  %vm383_vm3 = vweird.f32 %v509_v23 }
 0x2b5   :  { %v375_v28 = vsel %vm372_vm2, %v374_v24, %v370_v25  ;;  %vm384_vm5 = vmor %vm382_vm4, %vm383_vm3 }
 0x2b6   :  { %v376_v29 = vmul.f32 %v698_v30, %v375_v28  ;;  %v379_v31 = vsub.f32 1.0, %v378_v27 }
 0x2b8   :  { %425 = vst [vmem:[#allocation5 + $0x18] sm:$0xff] %v376_v29  ;;  %v380_v26 = vmul.f32 %v509_v23, %v379_v31 }
 0x2ba   :  { %v381_v35 = vadd.f32 %v509_v23, %v380_v26 }
 0x2bc   :  { %v385_v37 = vsel %vm384_vm5, %v509_v23, %v381_v35 }
 0x2bd   :  { %v390_v39 = vsel %vm387_vm6, %v389_v36, %v385_v37 }
 0x2be   :  { %v391_v40 = vmul.f32 %v701_v32, %v390_v39  ;;  %v316_v42 = vpop.xlane.xlu1 %315 }
 0x2bf   :  { %510 = vrcp.f32 %v316_v42  ;;  %v418_v46 = vand.u32 2147483648, %v316_v42  ;;  %v416_v48 = vand.u32 2147483647, %v316_v42  ;;  %vm412_vm8 = vweird.f32 %v316_v42 }
 0x2c0   :  { %426 = vst [vmem:[#allocation5 + $0x20] sm:$0xff] %v391_v40 }
 0x2c1   :  { %v419_v51 = vor.u32 1.1754944e-38, %v418_v46  ;;  %vm417_vm10 = vcmp.eq.f32.partialorder %v416_v48, 8.507059e+37 }
 0x2c5   :  { %v511_v43 = vpop.eup %510  ;;  %v313_v30 = vpop.xlane.xlu0 %312 }
 0x2c6   :  { %v408_v44 = vmul.f32 %v511_v43, %v316_v42  ;;  %512 = vrcp.f32 %v313_v30  ;;  %vm413_vm7 = vweird.f32 %v511_v43  ;;  %v403_v56 = vand.u32 2147483648, %v313_v30 }
 0x2c7   :  { %vm414_vm9 = vmor %vm412_vm8, %vm413_vm7  ;;  %v401_v58 = vand.u32 2147483647, %v313_v30  ;;  %vm397_vm12 = vweird.f32 %v313_v30 }
 0x2c8   :  { %v409_v45 = vsub.f32 1.0, %v408_v44  ;;  %v404_v60 = vor.u32 1.1754944e-38, %v403_v56 }
 0x2c9   :  { %vm402_vm14 = vcmp.eq.f32.partialorder %v401_v58, 8.507059e+37 }
 0x2ca   :  { %v410_v47 = vmul.f32 %v511_v43, %v409_v45 }
 0x2cc   :  { %v513_v49 = vpop.eup %512  ;;  %v411_v50 = vadd.f32 %v511_v43, %v410_v47 }
 0x2cd   :  { %v393_v52 = vmul.f32 %v513_v49, %v313_v30  ;;  %vm398_vm11 = vweird.f32 %v513_v49 }
 0x2ce   :  { %v415_v53 = vsel %vm414_vm9, %v511_v43, %v411_v50  ;;  %vm399_vm13 = vmor %vm397_vm12, %vm398_vm11 }
 0x2cf   :  { %v420_v32 = vsel %vm417_vm10, %v419_v51, %v415_v53  ;;  %v394_v54 = vsub.f32 1.0, %v393_v52 }
 0x2d0   :  { %v421_v55 = vmul.f32 %v704_v38, %v420_v32 }
 0x2d1   :  { %v395_v57 = vmul.f32 %v513_v49, %v394_v54 }
 0x2d2   :  { %428 = vst [vmem:[#allocation5 + $0x30] sm:$0x3] %v421_v55 }
 0x2d3   :  { %v396_v59 = vadd.f32 %v513_v49, %v395_v57 }
 0x2d5   :  { %v400_v61 = vsel %vm399_vm13, %v513_v49, %v396_v59 }
 0x2d6   :  { %v405_v62 = vsel %vm402_vm14, %v404_v60, %v400_v61 }
 0x2d7   :  { %v406_v38 = vmul.f32 %v708_v41, %v405_v62 }
 0x2d9   :  { %427 = vst [vmem:[#allocation5 + $0x28] sm:$0xff] %v406_v38 }
 0x2da   :  { %441 = dma.vmem_to_hbm [thread:$0]  %s434_s16, 896, %s436_s19, [#allocation4], %s567_s29, %s567_s29, %s568_s30  }
 0x2db   :  { %564 = dma.done.wait [#allocation4], 896  }
 0x2dc   :  { %565 = vsyncadd [#allocation4], 4294966400 }
 0x2dd   :  { %446 = vsyncpa [#allocation3], 1 }
 0x2de   :  { %447 = vsyncpa [#allocation4], 1 }

</bundles_post_ra>
